<compile_context>
chip_gen: v7x
topology: tpu7x:2x2x1
jax: 0.10.0
libtpu: 0.0.40
codegen_flags: <defaults>
</compile_context>

<pallas_src>
import functools
import math

import jax
import jax.numpy as jnp
from jax.experimental import pallas as pl
from jax.experimental.pallas import tpu as pltpu

HIDDEN = 512
IN_FEATURES = 2
OUT_FEATURES = 2
OUT_PAD = 128          # lane-dense output width


def _round_up(n, m):
    return ((n + m - 1) // m) * m


def _activation_dtype():
    """bf16 activations/tanh where the VPU/EUP support it (v6e, v7x); f32 otherwise."""
    try:
        kind = jax.devices()[0].device_kind.lower()
    except Exception:
        return jnp.bfloat16
    if any(tag in kind for tag in ("v2", "v3", "v4", "v5")):
        return jnp.float32     # no bf16 VPU/EUP on these chips
    return jnp.bfloat16


def _choose_tile(n):
    """Batch tile: minimize padding, keep the grid balanced across 2 TCs."""
    n8 = _round_up(n, 8)
    if n8 <= 512:
        return n8              # single tile, zero wasted rows beyond 8-row align
    pad512 = _round_up(n, 512) - n
    pad256 = _round_up(n, 256) - n
    g512 = _round_up(n, 512) // 512
    # 256-row tiles never pad more than 512-row tiles; also prefer them when the
    # 512-row grid would be odd (uneven split across v7x's two TensorCores).
    if pad256 < pad512 or (g512 % 2 == 1):
        return 256
    return 512


def _mlp_kernel(xin_ref, w1_ref, w2_ref, w3_ref, o_ref, *, act_dtype):
    # xin_ref: (TM, 2) f32     w1_ref: (2, 512) act_dtype
    # w2_ref: (512, 512) bf16  w3_ref: (512, 128) bf16 (zero-padded cols)
    # o_ref:  (TM, 128) bf16
    xin = xin_ref[...].astype(act_dtype)              # (TM, 2)
    a = xin[:, 0:1]                                   # x  column
    b = xin[:, 1:2]                                   # dx column
    w1 = w1_ref[...]                                  # (2, 512)

    # Layer 1 (K=2): VPU broadcast-FMA instead of a ~1.6%-utilization MXU matmul.
    pre1 = a * w1[0:1, :] + b * w1[1:2, :]            # (TM, 512)
    h1 = jnp.tanh(pre1)                               # EUP tanh in act_dtype

    # Layer 2: bf16 operands, f32 accumulation on the MXU.
    pre2 = jnp.dot(h1.astype(jnp.bfloat16), w2_ref[...],
                   preferred_element_type=jnp.float32)
    h2 = jnp.tanh(pre2.astype(act_dtype))             # (TM, 512)

    # Layer 3: lane-dense (TM, 128) output; real data lives in columns [:2].
    y = jnp.dot(h2.astype(jnp.bfloat16), w3_ref[...],
                preferred_element_type=jnp.float32)
    o_ref[...] = y.astype(o_ref.dtype)                # bf16 writeback


def netf_forward(x, dx, w1, w2, w3):
    """x, dx: [N, 1] float32. w1: [2,512], w2: [512,512], w3: [512,2].

    Returns y: [N, 2] float32 (== tanh(tanh([x,dx] @ w1) @ w2) @ w3, with the
    two 512-wide matmuls in bf16 operands / f32 accumulation and -- on chips
    with bf16 VPU/EUP -- bf16 activations/tanh).
    """
    x = x.astype(jnp.float32)
    dx = dx.astype(jnp.float32)
    n = x.shape[0]
    xin = jnp.concatenate([x, dx], axis=1)            # (N, 2) -- the torch.cat

    act_dtype = _activation_dtype()
    tm = _choose_tile(n)
    n_pad = _round_up(n, tm)
    if n_pad != n:
        xin = jnp.pad(xin, ((0, n_pad - n), (0, 0)))

    w1_c = w1.astype(act_dtype)                                       # (2, 512)
    w2_bf16 = w2.astype(jnp.bfloat16)                                 # (512, 512)
    w3_pad = jnp.pad(w3.astype(jnp.bfloat16),
                     ((0, 0), (0, OUT_PAD - OUT_FEATURES)))           # (512, 128)

    grid = (n_pad // tm,)
    kernel = functools.partial(_mlp_kernel, act_dtype=act_dtype)

    out = pl.pallas_call(
        kernel,
        out_shape=jax.ShapeDtypeStruct((n_pad, OUT_PAD), jnp.bfloat16),
        grid=grid,
        in_specs=[
            pl.BlockSpec((tm, IN_FEATURES), lambda i: (i, 0)),        # [x|dx] tile (pipelined)
            pl.BlockSpec((2, HIDDEN), lambda i: (0, 0)),              # W1 resident
            pl.BlockSpec((HIDDEN, HIDDEN), lambda i: (0, 0)),         # W2 resident
            pl.BlockSpec((HIDDEN, OUT_PAD), lambda i: (0, 0)),        # W3 (padded) resident
        ],
        out_specs=pl.BlockSpec((tm, OUT_PAD), lambda i: (i, 0)),
        compiler_params=pltpu.CompilerParams(
            dimension_semantics=("parallel",),
            vmem_limit_bytes=32 * 1024 * 1024,
        ),
    )(xin, w1_c, w2_bf16, w3_pad)

    return out[:n, :OUT_FEATURES].astype(jnp.float32)


def _init_linear_weight(key, in_features, out_features):
    # PyTorch nn.Linear default init: U(-1/sqrt(fan_in), 1/sqrt(fan_in)),
    # weight shape [out, in]. We store the transpose [in, out].
    bound = 1.0 / math.sqrt(in_features)
    w = jax.random.uniform(
        key, (out_features, in_features), dtype=jnp.float32,
        minval=-bound, maxval=bound)
    return w.T  # [in, out]


def _ref_f32(xin, w1, w2, w3):
    # Pure-f32 reference of the PyTorch forward.
    return jnp.tanh(jnp.tanh(xin @ w1) @ w2) @ w3


if __name__ == "__main__":
    key = jax.random.PRNGKey(0)
    k_x, k_dx, k1, k2, k3 = jax.random.split(key, 5)

    w1 = _init_linear_weight(k1, 2, HIDDEN)              # [2, 512]
    w2 = _init_linear_weight(k2, HIDDEN, HIDDEN)         # [512, 512]
    w3 = _init_linear_weight(k3, HIDDEN, OUT_FEATURES)   # [512, 2]

    # Small batch; forward implies x and dx are [N, 1] each (concat -> [N, 2]).
    N = 8
    x = jax.random.normal(k_x, (N, 1), dtype=jnp.float32)
    dx = jax.random.normal(k_dx, (N, 1), dtype=jnp.float32)

    y = jax.block_until_ready(netf_forward(x, dx, w1, w2, w3))
    assert y.shape == (N, OUT_FEATURES)

    xin = jnp.concatenate([x, dx], axis=1)
    # Loose check vs the pure-f32 PyTorch-equivalent reference (kernel uses
    # bf16 matmul operands and, on v6e/v7x, bf16 activations).
    assert jnp.allclose(y, _ref_f32(xin, w1, w2, w3), atol=5e-2, rtol=5e-2)

    # Exercise the batch-tiled grid + padding path with a larger, non-aligned N.
    N2 = 2500
    k_x2, k_dx2 = jax.random.split(jax.random.PRNGKey(1), 2)
    x2 = jax.random.normal(k_x2, (N2, 1), dtype=jnp.float32)
    dx2 = jax.random.normal(k_dx2, (N2, 1), dtype=jnp.float32)
    y2 = jax.block_until_ready(netf_forward(x2, dx2, w1, w2, w3))
    xin2 = jnp.concatenate([x2, dx2], axis=1)
    assert y2.shape == (N2, OUT_FEATURES)
    assert jnp.allclose(y2, _ref_f32(xin2, w1, w2, w3), atol=5e-2, rtol=5e-2)

    print("KERNEL_OK")
</pallas_src>

<mosaic_0001>
module attributes {stable_mosaic.version = 11 : i64} {
  func.func @_mlp_kernel(%arg0: i32, %arg1: memref<8x2xf32, #tpu.memory_space<vmem>>, %arg2: memref<2x512xbf16, #tpu.memory_space<vmem>>, %arg3: memref<512x512xbf16, #tpu.memory_space<vmem>>, %arg4: memref<512x128xbf16, #tpu.memory_space<vmem>>, %arg5: memref<8x128xbf16, #tpu.memory_space<vmem>>) attributes {dimension_semantics = [#tpu.dimension_semantics<parallel>], iteration_bounds = array<i64: 1>, scalar_prefetch = 0 : i64, scratch_operands = 0 : i64, tpu.core_type = #tpu.core_type<tc>, window_params = [{transform_indices = @transform_0, window_bounds = array<i64: 8, 2>}, {pipeline_mode = #tpu.pipeline_mode<synchronous>, transform_indices = @transform_1, window_bounds = array<i64: 2, 512>}, {pipeline_mode = #tpu.pipeline_mode<synchronous>, transform_indices = @transform_2, window_bounds = array<i64: 512, 512>}, {pipeline_mode = #tpu.pipeline_mode<synchronous>, transform_indices = @transform_3, window_bounds = array<i64: 512, 128>}, {transform_indices = @transform_4, window_bounds = array<i64: 8, 128>}]} {
    %c0 = arith.constant 0 : index
    %c0_0 = arith.constant 0 : index
    %0 = vector.load %arg1[%c0, %c0_0] : memref<8x2xf32, #tpu.memory_space<vmem>>, vector<8x2xf32>
    %1 = arith.truncf %0 : vector<8x2xf32> to vector<8x2xbf16>
    %2 = vector.extract_strided_slice %1 {offsets = [0, 0], sizes = [8, 1], strides = [1, 1]} : vector<8x2xbf16> to vector<8x1xbf16>
    %3 = vector.extract_strided_slice %1 {offsets = [0, 1], sizes = [8, 1], strides = [1, 1]} : vector<8x2xbf16> to vector<8x1xbf16>
    %c0_1 = arith.constant 0 : index
    %c0_2 = arith.constant 0 : index
    %4 = vector.load %arg2[%c0_1, %c0_2] : memref<2x512xbf16, #tpu.memory_space<vmem>>, vector<2x512xbf16>
    %5 = vector.extract_strided_slice %4 {offsets = [0, 0], sizes = [1, 512], strides = [1, 1]} : vector<2x512xbf16> to vector<1x512xbf16>
    %6 = vector.broadcast %2 : vector<8x1xbf16> to vector<8x512xbf16>
    %7 = vector.broadcast %5 : vector<1x512xbf16> to vector<8x512xbf16>
    %8 = arith.mulf %6, %7 : vector<8x512xbf16>
    %9 = vector.extract_strided_slice %4 {offsets = [1, 0], sizes = [1, 512], strides = [1, 1]} : vector<2x512xbf16> to vector<1x512xbf16>
    %10 = vector.broadcast %3 : vector<8x1xbf16> to vector<8x512xbf16>
    %11 = vector.broadcast %9 : vector<1x512xbf16> to vector<8x512xbf16>
    %12 = arith.mulf %10, %11 : vector<8x512xbf16>
    %13 = arith.addf %8, %12 : vector<8x512xbf16>
    %14 = math.tanh %13 : vector<8x512xbf16>
    %c0_3 = arith.constant 0 : index
    %c0_4 = arith.constant 0 : index
    %15 = vector.load %arg3[%c0_3, %c0_4] : memref<512x512xbf16, #tpu.memory_space<vmem>>, vector<512x512xbf16>
    %cst = arith.constant dense<0.000000e+00> : vector<8x512xf32>
    %16 = tpu.matmul %14, %15, %cst {dimension_numbers = #tpu.dot_dimension_numbers<[1], [0], [0], [1], [0, 0, 1, 1], [], []>} : vector<8x512xbf16>, vector<512x512xbf16>, vector<8x512xf32> -> vector<8x512xf32>
    %17 = arith.truncf %16 : vector<8x512xf32> to vector<8x512xbf16>
    %18 = math.tanh %17 : vector<8x512xbf16>
    %c0_5 = arith.constant 0 : index
    %c0_6 = arith.constant 0 : index
    %19 = vector.load %arg4[%c0_5, %c0_6] : memref<512x128xbf16, #tpu.memory_space<vmem>>, vector<512x128xbf16>
    %cst_7 = arith.constant dense<0.000000e+00> : vector<8x128xf32>
    %20 = tpu.matmul %18, %19, %cst_7 {dimension_numbers = #tpu.dot_dimension_numbers<[1], [0], [0], [1], [0, 0, 1, 1], [], []>} : vector<8x512xbf16>, vector<512x128xbf16>, vector<8x128xf32> -> vector<8x128xf32>
    %21 = arith.truncf %20 : vector<8x128xf32> to vector<8x128xbf16>
    %c0_8 = arith.constant 0 : index
    %c0_9 = arith.constant 0 : index
    %22 = vector.load %arg5[%c0_8, %c0_9] : memref<8x128xbf16, #tpu.memory_space<vmem>>, vector<8x128xbf16>
    tpu.vector_store %arg5[%c0_8, %c0_9], %21 {strides = array<i32>} : memref<8x128xbf16, #tpu.memory_space<vmem>>, vector<8x128xbf16>,
    return
  }
  func.func @transform_0(%arg0: i32) -> (i32, i32) {
    %c0_i32 = arith.constant 0 : i32
    %c0_i32_0 = arith.constant 0 : i32
    return %arg0, %c0_i32 : i32, i32
  }
  func.func @transform_1(%arg0: i32) -> (i32, i32) {
    %c0_i32 = arith.constant 0 : i32
    %c0_i32_0 = arith.constant 0 : i32
    %c0_i32_1 = arith.constant 0 : i32
    return %c0_i32, %c0_i32_0 : i32, i32
  }
  func.func @transform_2(%arg0: i32) -> (i32, i32) {
    %c0_i32 = arith.constant 0 : i32
    %c0_i32_0 = arith.constant 0 : i32
    %c0_i32_1 = arith.constant 0 : i32
    return %c0_i32, %c0_i32_0 : i32, i32
  }
  func.func @transform_3(%arg0: i32) -> (i32, i32) {
    %c0_i32 = arith.constant 0 : i32
    %c0_i32_0 = arith.constant 0 : i32
    %c0_i32_1 = arith.constant 0 : i32
    return %c0_i32, %c0_i32_0 : i32, i32
  }
  func.func @transform_4(%arg0: i32) -> (i32, i32) {
    %c0_i32 = arith.constant 0 : i32
    %c0_i32_0 = arith.constant 0 : i32
    return %arg0, %c0_i32 : i32, i32
  }
}

</mosaic_0001>

<bundles_post_ra>
// kernel: tpu_custom_call.1
= control target key start
LH: loop header
LB: loop body
LE: loop exit
PB: predicated region body
PF: predicated region fallthrough
CT: control target
= control target key end

     0   :  { %9 = vsyncpa [#allocation3], 0  ;;  %s2067_s0 = inlined_call_operand.vmem [shape: f32[8,2], index: 0, kind: input, shape index: {}]   ;;  %s2068_s1 = inlined_call_operand.vmem [shape: bf16[2,512], index: 1, kind: input, shape index: {}]   ;;  %s2069_s2 = inlined_call_operand.hbm [shape: bf16[512,512], index: 2, kind: input, shape index: {}]   ;;  %s2070_s3 = inlined_call_operand.hbm [shape: bf16[512,128], index: 3, kind: input, shape index: {}]   ;;  %s2071_s4 = inlined_call_operand.hbm [shape: bf16[8,128], index: 4, kind: output, shape index: {}]  }
   0x1   :  { %10 = vsyncpa [#allocation6], 0 }
   0x2   :  { %11 = vsyncpa [#allocation4], 0  ;;  %s1987_s15 = smov [#allocation2]   ;;  %s1915_s19 = scalar_lea.hbm %s2069_s2, 16384 }
   0x3   :  { %s21_s16 = sshll.u32 %s1987_s15, 4  ;;  %p1916_p0 = scmp.ne.s32.totalorder %s2069_s2, %s1915_s19  ;;  %s22_s16 = int_to_ptr.vmem [resolvable:$true] %s21_s16 }
   0x4   :  { %p1919_p1 = scmp.lt.u32.totalorder %s1915_s19, %s2069_s2 }
   0x6   :  { %p1921_p2 = pnand %p1919_p1, %p1916_p0 }
   0x8   :  { %1924 = shalt.err (!%p1921_p2)
}
   0x9   :  { %s1925_s24 = scalar_lea.vmem %s22_s16, 16384  ;;  %p1930_p4 = scmp.lt.s32.totalorder %s22_s16, %s22_s16 }
   0xa   :  { %p1926_p3 = scmp.ne.s32.totalorder %s22_s16, %s1925_s24  ;;  %p1931_p5 = scmp.lt.s32.totalorder %s1925_s24, %s1925_s24 }
   0xc   :  { %p1932_p6 = por %p1931_p5, %p1930_p4 }
   0xe   :  { %p1933_p7 = pnand %p1932_p6, %p1926_p3 }
  0x10   :  { %1936 = shalt.err (!%p1933_p7)
}
  0x11   :  { %s1988_s25 = smov 256   ;;  %s1989_s26 = smov 16  }
  0x12   :  { %27 = dma.hbm_to_vmem [thread:$0]  %s2069_s2, 16384, %s22_s16, [#allocation3], %s1988_s25, %s1988_s25, %s1989_s26  }
  0x13   :  { %s1990_s29 = smov [#allocation5]   ;;  %s1937_s7 = scalar_lea.hbm %s2070_s3, 4096 }
  0x14   :  { %s33_s30 = sshll.u32 %s1990_s29, 4  ;;  %p1938_p8 = scmp.ne.s32.totalorder %s2070_s3, %s1937_s7  ;;  %s34_s30 = int_to_ptr.vmem [resolvable:$true] %s33_s30 }
  0x15   :  { %p1941_p9 = scmp.lt.u32.totalorder %s1937_s7, %s2070_s3 }
  0x17   :  { %p1943_p10 = pnand %p1941_p9, %p1938_p8 }
  0x19   :  { %1946 = shalt.err (!%p1943_p10)
}
  0x1a   :  { %s1947_s12 = scalar_lea.vmem %s34_s30, 4096  ;;  %p1952_p12 = scmp.lt.s32.totalorder %s34_s30, %s34_s30 }
  0x1b   :  { %p1948_p11 = scmp.ne.s32.totalorder %s34_s30, %s1947_s12  ;;  %p1953_p13 = scmp.lt.s32.totalorder %s1947_s12, %s1947_s12 }
  0x1d   :  { %p1954_p0 = por %p1953_p13, %p1952_p12 }
  0x1f   :  { %p1955_p1 = pnand %p1954_p0, %p1948_p11 }
  0x21   :  { %1958 = shalt.err (!%p1955_p1)
}
  0x22   :  { %s1991_s2 = smov 64   ;;  %s1992_s13 = smov 4  }
  0x23   :  { %39 = dma.hbm_to_vmem [thread:$0]  %s2070_s3, 4096, %s34_s30, [#allocation6], %s1991_s2, %s1991_s2, %s1992_s13  }
  0x24   :  { %1981 = dma.done.wait [#allocation3], 16384  }
  0x25   :  { %1982 = vsyncadd [#allocation3], 4294950912 }
  0x26   :  { %1983 = dma.done.wait [#allocation6], 4096  }
  0x27   :  { %1984 = vsyncadd [#allocation6], 4294963200  ;;  %v1993_v0 = vmov 0   ;;  %v47_v1 = vld [vmem:[%s2067_s0] sm:$0xff]  ;;  %v1677_v4 = vld [vmem:[#allocation2 + $0xc] ss:$16 sps:$4 sm:$0xff]  }
  0x28   :  { %1673 = vset.pattern.permute.xlu0 %v1993_v0  ;;  %v48_v2 = vpack.c.bf16 %v47_v1, %v47_v1  ;;  %v1675_v3 = vld [vmem:[#allocation2 + $0x4] ss:$16 sps:$4 sm:$0xff]   ;;  %v1679_v5 = vld [vmem:[#allocation2] ss:$16 sps:$4 sm:$0xff]   ;;  %v1680_v6 = vld [vmem:[#allocation2 + $0x8] ss:$16 sps:$4 sm:$0xff]   ;;  %1006 = vmatprep.subr.bf16.mxu1 %v1677_v4 }
  0x29   :  { %924 = vmatprep.subr.bf16.mxu0 %v1675_v3  ;;  %v1681_v7 = vld [vmem:[#allocation2 + $0x24] ss:$16 sps:$4 sm:$0xff]   ;;  %v1683_v8 = vld [vmem:[#allocation2 + $0x2c] ss:$16 sps:$4 sm:$0xff]   ;;  %1007 = vmatpush1.bf16.msra.mxu1 %v1680_v6  ;;  %v1685_v9 = vld [vmem:[#allocation2 + $0x20] ss:$16 sps:$4 sm:$0xff]   ;;  %v67_v6 = vlaneseq }
  0x2a   :  { %52 = vperm.xlu0 %1673, %v48_v2   ;;  %925 = vmatpush1.bf16.msra.mxu0 %v1679_v5  ;;  %v1686_v10 = vld [vmem:[#allocation2 + $0x28] ss:$16 sps:$4 sm:$0xff]   ;;  %v1687_v11 = vld [vmem:[#allocation2 + $0x44] ss:$16 sps:$4 sm:$0xff]   ;;  %v1994_v12 = vmov 1  }
  0x2b   :  { %926 = vmatprep.subr.bf16.mxu0 %v1681_v7  ;;  %1008 = vmatprep.subr.bf16.mxu1 %v1683_v8  ;;  %v1689_v13 = vld [vmem:[#allocation2 + $0x4c] ss:$16 sps:$4 sm:$0xff]   ;;  %v1691_v14 = vld [vmem:[#allocation2 + $0x40] ss:$16 sps:$4 sm:$0xff]   ;;  %v1692_v15 = vld [vmem:[#allocation2 + $0x48] ss:$16 sps:$4 sm:$0xff]  }
  0x2c   :  { %v1693_v16 = vld [vmem:[#allocation2 + $0x64] ss:$16 sps:$4 sm:$0xff]   ;;  %v1695_v17 = vld [vmem:[#allocation2 + $0x6c] ss:$16 sps:$4 sm:$0xff]   ;;  %v1697_v18 = vld [vmem:[#allocation2 + $0x60] ss:$16 sps:$4 sm:$0xff]  }
  0x2d   :  { %1009 = vmatpush1.bf16.msra.mxu1 %v1686_v10  ;;  %v1698_v19 = vld [vmem:[#allocation2 + $0x68] ss:$16 sps:$4 sm:$0xff]   ;;  %v1699_v20 = vld [vmem:[#allocation2 + $0x84] ss:$16 sps:$4 sm:$0xff]   ;;  %v1701_v21 = vld [vmem:[#allocation2 + $0x8c] ss:$16 sps:$4 sm:$0xff]  }
  0x2e   :  { %1674 = vset.pattern.permute.xlu0 %v1994_v12  ;;  %927 = vmatpush1.bf16.msra.mxu0 %v1685_v9  ;;  %v1703_v22 = vld [vmem:[#allocation2 + $0x80] ss:$16 sps:$4 sm:$0xff]   ;;  %v1704_v23 = vld [vmem:[#allocation2 + $0x88] ss:$16 sps:$4 sm:$0xff]   ;;  %v1705_v24 = vld [vmem:[#allocation2 + $0xa4] ss:$16 sps:$4 sm:$0xff]  }
  0x2f   :  { %113 = vperm.xlu0 %1674, %v48_v2   ;;  %928 = vmatprep.subr.bf16.mxu0 %v1687_v11  ;;  %v1707_v25 = vld [vmem:[#allocation2 + $0xac] ss:$16 sps:$4 sm:$0xff]   ;;  %v1709_v26 = vld [vmem:[#allocation2 + $0xa0] ss:$16 sps:$4 sm:$0xff]   ;;  %v1710_v27 = vld [vmem:[#allocation2 + $0xa8] ss:$16 sps:$4 sm:$0xff]  }
  0x30   :  { %1010 = vmatprep.subr.bf16.mxu1 %v1689_v13  ;;  %v1711_v28 = vld [vmem:[#allocation2 + $0xc4] ss:$16 sps:$4 sm:$0xff]   ;;  %v1713_v29 = vld [vmem:[#allocation2 + $0xcc] ss:$16 sps:$4 sm:$0xff]   ;;  %v1715_v30 = vld [vmem:[#allocation2 + $0xc0] ss:$16 sps:$4 sm:$0xff]  }
  0x31   :  { %1011 = vmatpush1.bf16.msra.mxu1 %v1692_v15  ;;  %v1716_v31 = vld [vmem:[#allocation2 + $0xc8] ss:$16 sps:$4 sm:$0xff]   ;;  %v1717_v32 = vld [vmem:[#allocation2 + $0xe4] ss:$16 sps:$4 sm:$0xff]   ;;  %v1719_v33 = vld [vmem:[#allocation2 + $0xec] ss:$16 sps:$4 sm:$0xff]  }
  0x32   :  { %929 = vmatpush1.bf16.msra.mxu0 %v1691_v14  ;;  %1012 = vmatprep.subr.bf16.mxu1 %v1695_v17  ;;  %v1721_v34 = vld [vmem:[#allocation2 + $0xe0] ss:$16 sps:$4 sm:$0xff]   ;;  %v1722_v35 = vld [vmem:[#allocation2 + $0xe8] ss:$16 sps:$4 sm:$0xff]   ;;  %v1723_v36 = vld [vmem:[#allocation2 + $0x104] ss:$16 sps:$4 sm:$0xff]  }
  0x33   :  { %930 = vmatprep.subr.bf16.mxu0 %v1693_v16  ;;  %v1725_v37 = vld [vmem:[#allocation2 + $0x10c] ss:$16 sps:$4 sm:$0xff]   ;;  %v1727_v38 = vld [vmem:[#allocation2 + $0x100] ss:$16 sps:$4 sm:$0xff]   ;;  %v1728_v39 = vld [vmem:[#allocation2 + $0x108] ss:$16 sps:$4 sm:$0xff]  }
  0x34   :  { %v1729_v40 = vld [vmem:[#allocation2 + $0x124] ss:$16 sps:$4 sm:$0xff]   ;;  %v1731_v41 = vld [vmem:[#allocation2 + $0x12c] ss:$16 sps:$4 sm:$0xff]   ;;  %v1733_v42 = vld [vmem:[#allocation2 + $0x120] ss:$16 sps:$4 sm:$0xff]  }
  0x35   :  { %1013 = vmatpush1.bf16.msra.mxu1 %v1698_v19  ;;  %v1734_v43 = vld [vmem:[#allocation2 + $0x128] ss:$16 sps:$4 sm:$0xff]   ;;  %v1735_v44 = vld [vmem:[#allocation2 + $0x144] ss:$16 sps:$4 sm:$0xff]   ;;  %v1737_v45 = vld [vmem:[#allocation2 + $0x14c] ss:$16 sps:$4 sm:$0xff]  }
  0x36   :  { %931 = vmatpush1.bf16.msra.mxu0 %v1697_v18  ;;  %1014 = vmatprep.subr.bf16.mxu1 %v1701_v21  ;;  %v1739_v46 = vld [vmem:[#allocation2 + $0x140] ss:$16 sps:$4 sm:$0xff]   ;;  %v1740_v47 = vld [vmem:[#allocation2 + $0x148] ss:$16 sps:$4 sm:$0xff]   ;;  %v1741_v48 = vld [vmem:[#allocation2 + $0x164] ss:$16 sps:$4 sm:$0xff]  }
  0x37   :  { %932 = vmatprep.subr.bf16.mxu0 %v1699_v20  ;;  %v1743_v49 = vld [vmem:[#allocation2 + $0x16c] ss:$16 sps:$4 sm:$0xff]   ;;  %v1745_v50 = vld [vmem:[#allocation2 + $0x160] ss:$16 sps:$4 sm:$0xff]   ;;  %v1746_v51 = vld [vmem:[#allocation2 + $0x168] ss:$16 sps:$4 sm:$0xff]  }
  0x38   :  { %v1747_v52 = vld [vmem:[#allocation2 + $0x184] ss:$16 sps:$4 sm:$0xff]   ;;  %v1749_v53 = vld [vmem:[#allocation2 + $0x18c] ss:$16 sps:$4 sm:$0xff]   ;;  %v1751_v54 = vld [vmem:[#allocation2 + $0x180] ss:$16 sps:$4 sm:$0xff]  }
  0x39   :  { %1015 = vmatpush1.bf16.msra.mxu1 %v1704_v23  ;;  %v1752_v55 = vld [vmem:[#allocation2 + $0x188] ss:$16 sps:$4 sm:$0xff]   ;;  %v1753_v56 = vld [vmem:[#allocation2 + $0x1a4] ss:$16 sps:$4 sm:$0xff]   ;;  %v1755_v57 = vld [vmem:[#allocation2 + $0x1ac] ss:$16 sps:$4 sm:$0xff]  }
  0x3a   :  { %933 = vmatpush1.bf16.msra.mxu0 %v1703_v22  ;;  %1016 = vmatprep.subr.bf16.mxu1 %v1707_v25  ;;  %v1757_v58 = vld [vmem:[#allocation2 + $0x1a0] ss:$16 sps:$4 sm:$0xff]   ;;  %v1758_v59 = vld [vmem:[#allocation2 + $0x1a8] ss:$16 sps:$4 sm:$0xff]   ;;  %v1759_v60 = vld [vmem:[#allocation2 + $0x1c4] ss:$16 sps:$4 sm:$0xff]  }
  0x3b   :  { %934 = vmatprep.subr.bf16.mxu0 %v1705_v24  ;;  %v1761_v61 = vld [vmem:[#allocation2 + $0x1cc] ss:$16 sps:$4 sm:$0xff]   ;;  %v1763_v62 = vld [vmem:[#allocation2 + $0x1c0] ss:$16 sps:$4 sm:$0xff]   ;;  %v1764_v63 = vld [vmem:[#allocation2 + $0x1c8] ss:$16 sps:$4 sm:$0xff]  }
  0x3c   :  { %v1765_v0 = vld [vmem:[#allocation2 + $0x1e4] ss:$16 sps:$4 sm:$0xff]   ;;  %v1767_v1 = vld [vmem:[#allocation2 + $0x1ec] ss:$16 sps:$4 sm:$0xff]   ;;  %v1769_v2 = vld [vmem:[#allocation2 + $0x1e0] ss:$16 sps:$4 sm:$0xff]  }
  0x3d   :  { %1017 = vmatpush1.bf16.msra.mxu1 %v1710_v27  ;;  %v1770_v3 = vld [vmem:[#allocation2 + $0x1e8] ss:$16 sps:$4 sm:$0xff]   ;;  %v1773_v4 = vld [vmem:[#allocation2 + $0x204] ss:$16 sps:$4 sm:$0xff]   ;;  %v1776_v5 = vld [vmem:[#allocation2 + $0x20c] ss:$16 sps:$4 sm:$0xff]  }
  0x3e   :  { %935 = vmatpush1.bf16.msra.mxu0 %v1709_v26  ;;  %1018 = vmatprep.subr.bf16.mxu1 %v1713_v29  ;;  %v1995_v7 = vmov 1966171168   ;;  %v68_v9 = vshrl.u32 %v67_v6, 7  ;;  %v1797_v6 = vld [vmem:[#allocation2 + $0x284] ss:$16 sps:$4 sm:$0xff]  }
  0x3f   :  { %936 = vmatprep.subr.bf16.mxu0 %v1711_v28  ;;  %v65_v8 = vunpack.c.l.s4 %v1995_v7  ;;  %v1450_v11 = vld.sshfl [vmem:[%s2068_s1] sm:$0x33 pattern:$0x75316420]  ;;  %v1800_v7 = vld [vmem:[#allocation2 + $0x28c] ss:$16 sps:$4 sm:$0xff]  }
  0x40   :  { %v63_v13 = vcombine.high %v1450_v11, %v1450_v11  ;;  %v85_v18 = vsub.s32 0, %v68_v9  ;;  %s1996_s1 = smov [#allocation7]  }
  0x41   :  { %1019 = vmatpush1.bf16.msra.mxu1 %v1716_v31  ;;  %v66_v10 = vunpack.c.0.s8 %v65_v8  ;;  %v1795_v8 = vld [vmem:[#allocation2 + $0x280] ss:$16 sps:$4 sm:$0xff]   ;;  %s1440_s18 = sshll.u32 %s1996_s1, 4  ;;  %s1441_s18 = int_to_ptr.vmem [resolvable:$true] %s1440_s18 }
  0x42   :  { %937 = vmatpush1.bf16.msra.mxu0 %v1715_v30  ;;  %1020 = vmatprep.subr.bf16.mxu1 %v1719_v33  ;;  %s1959_s19 = scalar_lea.vmem %s1441_s18, 64  ;;  %p1964_p3 = scmp.lt.s32.totalorder %s1441_s18, %s1441_s18 }
  0x43   :  { %938 = vmatprep.subr.bf16.mxu0 %v1717_v32  ;;  %v69_v12 = vsub.s32 %v66_v10, %v68_v9  ;;  %v1798_v9 = vld [vmem:[#allocation2 + $0x288] ss:$16 sps:$4 sm:$0xff]   ;;  %v1803_v10 = vld [vmem:[#allocation2 + $0x2a4] ss:$16 sps:$4 sm:$0xff]   ;;  %p1960_p2 = scmp.ne.s32.totalorder %s1441_s18, %s1959_s19  ;;  %p1965_p4 = scmp.lt.s32.totalorder %s1959_s19, %s1959_s19 }
  0x45   :  { %1021 = vmatpush1.bf16.msra.mxu1 %v1722_v35  ;;  %v70_v14 = vrot.slane %v1450_v11, %v69_v12  ;;  %v77_v15 = vrot.slane %v63_v13, %v69_v12  ;;  %v1806_v11 = vld [vmem:[#allocation2 + $0x2ac] ss:$16 sps:$4 sm:$0xff]   ;;  %v1801_v12 = vld [vmem:[#allocation2 + $0x2a0] ss:$16 sps:$4 sm:$0xff]   ;;  %v1804_v13 = vld [vmem:[#allocation2 + $0x2a8] ss:$16 sps:$4 sm:$0xff]   ;;  %p1966_p5 = por %p1965_p4, %p1964_p3 }
  0x46   :  { %939 = vmatpush1.bf16.msra.mxu0 %v1721_v34  ;;  %1022 = vmatprep.subr.bf16.mxu1 %v1725_v37 }
  0x47   :  { %940 = vmatprep.subr.bf16.mxu0 %v1723_v36  ;;  %v78_v16 = vcombine.high %v70_v14, %v70_v14  ;;  %v79_v17 = vcombine.high %v77_v15, %v77_v15  ;;  %v116_v20 = vshrl.u32 %v70_v14, 16  ;;  %v123_v21 = vshrl.u32 %v77_v15, 16  ;;  %p1967_p6 = pnand %p1966_p5, %p1960_p2 }
  0x48   :  { %v81_v24 = vpack.i.b16 %v70_v14, %v70_v14  ;;  %v88_v25 = vpack.i.b16 %v77_v15, %v77_v15  ;;  %v1809_v14 = vld [vmem:[#allocation2 + $0x2c4] ss:$16 sps:$4 sm:$0xff]   ;;  %v1812_v15 = vld [vmem:[#allocation2 + $0x2cc] ss:$16 sps:$4 sm:$0xff]  }
  0x49   :  { %1023 = vmatpush1.bf16.msra.mxu1 %v1728_v39  ;;  %v95_v19 = vpack.i.b16 %v78_v16, %v78_v16  ;;  %v130_v22 = vshrl.u32 %v78_v16, 16  ;;  %v137_v23 = vshrl.u32 %v79_v17, 16  ;;  %v117_v27 = vpack.i.b16 %v116_v20, %v116_v20  ;;  %v1807_v16 = vld [vmem:[#allocation2 + $0x2c0] ss:$16 sps:$4 sm:$0xff]  }
  0x4a   :  { %941 = vmatpush1.bf16.msra.mxu0 %v1727_v38  ;;  %1024 = vmatprep.subr.bf16.mxu1 %v1731_v41  ;;  %v124_v28 = vpack.i.b16 %v123_v21, %v123_v21  ;;  %v102_v31 = vpack.i.b16 %v79_v17, %v79_v17  ;;  %v86_v33 = vrot.slane %v81_v24, %v85_v18  ;;  %v1810_v17 = vld [vmem:[#allocation2 + $0x2c8] ss:$16 sps:$4 sm:$0xff]   ;;  %v1813_v20 = vld [vmem:[#allocation2 + $0x2e0] ss:$16 sps:$4 sm:$0xff]  }
  0x4b   :  { %942 = vmatprep.subr.bf16.mxu0 %v1729_v40  ;;  %v100_v26 = vrot.slane %v95_v19, %v85_v18  ;;  %v131_v29 = vpack.i.b16 %v130_v22, %v130_v22  ;;  %v138_v30 = vpack.i.b16 %v137_v23, %v137_v23  ;;  %v93_v34 = vrot.slane %v88_v25, %v85_v18  ;;  %v1818_v19 = vld [vmem:[#allocation2 + $0x2ec] ss:$16 sps:$4 sm:$0xff]   ;;  %v1816_v21 = vld [vmem:[#allocation2 + $0x2e8] ss:$16 sps:$4 sm:$0xff]   ;;  %v1821_v22 = vld [vmem:[#allocation2 + $0x304] ss:$16 sps:$4 sm:$0xff]  }
  0x4c   :  { %v122_v36 = vrot.slane %v117_v27, %v85_v18  ;;  %v129_v37 = vrot.slane %v124_v28, %v85_v18  ;;  %v107_v40 = vrot.slane %v102_v31, %v85_v18  ;;  %v1824_v23 = vld [vmem:[#allocation2 + $0x30c] ss:$16 sps:$4 sm:$0xff]   ;;  %v1819_v24 = vld [vmem:[#allocation2 + $0x300] ss:$16 sps:$4 sm:$0xff]   ;;  %v1822_v25 = vld [vmem:[#allocation2 + $0x308] ss:$16 sps:$4 sm:$0xff]  }
  0x4d   :  { %1025 = vmatpush1.bf16.msra.mxu1 %v1734_v43  ;;  %v136_v38 = vrot.slane %v131_v29, %v85_v18  ;;  %v143_v39 = vrot.slane %v138_v30, %v85_v18  ;;  %v1815_v18 = vld [vmem:[#allocation2 + $0x2e4] ss:$16 sps:$4 sm:$0xff]   ;;  %v1830_v27 = vld [vmem:[#allocation2 + $0x32c] ss:$16 sps:$4 sm:$0xff]   ;;  %v1825_v28 = vld [vmem:[#allocation2 + $0x320] ss:$16 sps:$4 sm:$0xff]  }
  0x4e   :  { %943 = vmatpush1.bf16.msra.mxu0 %v1733_v42  ;;  %1026 = vmatprep.subr.bf16.mxu1 %v1737_v45  ;;  %v1828_v29 = vld [vmem:[#allocation2 + $0x328] ss:$16 sps:$4 sm:$0xff]   ;;  %v1833_v30 = vld [vmem:[#allocation2 + $0x344] ss:$16 sps:$4 sm:$0xff]   ;;  %v1836_v31 = vld [vmem:[#allocation2 + $0x34c] ss:$16 sps:$4 sm:$0xff]  }
  0x4f   :  { %944 = vmatprep.subr.bf16.mxu0 %v1735_v44 }
  0x51   :  { %1027 = vmatpush1.bf16.msra.mxu1 %v1740_v47 }
  0x52   :  { %945 = vmatpush1.bf16.msra.mxu0 %v1739_v46  ;;  %1028 = vmatprep.subr.bf16.mxu1 %v1743_v49 }
  0x53   :  { %946 = vmatprep.subr.bf16.mxu0 %v1741_v48 }
  0x55   :  { %1029 = vmatpush1.bf16.msra.mxu1 %v1746_v51 }
  0x56   :  { %947 = vmatpush1.bf16.msra.mxu0 %v1745_v50  ;;  %1030 = vmatprep.subr.bf16.mxu1 %v1749_v53 }
  0x57   :  { %948 = vmatprep.subr.bf16.mxu0 %v1747_v52 }
  0x59   :  { %1031 = vmatpush1.bf16.msra.mxu1 %v1752_v55  ;;  %v1774_v55 = vld [vmem:[#allocation2 + $0x208] ss:$16 sps:$4 sm:$0xff]  }
  0x5a   :  { %949 = vmatpush1.bf16.msra.mxu0 %v1751_v54  ;;  %1032 = vmatprep.subr.bf16.mxu1 %v1755_v57  ;;  %v1771_v54 = vld [vmem:[#allocation2 + $0x200] ss:$16 sps:$4 sm:$0xff]   ;;  %v1779_v57 = vld [vmem:[#allocation2 + $0x224] ss:$16 sps:$4 sm:$0xff]  }
  0x5b   :  { %950 = vmatprep.subr.bf16.mxu0 %v1753_v56 }
  0x5d   :  { %1033 = vmatpush1.bf16.msra.mxu1 %v1758_v59 }
  0x5e   :  { %951 = vmatpush1.bf16.msra.mxu0 %v1757_v58  ;;  %1034 = vmatprep.subr.bf16.mxu1 %v1761_v61  ;;  %v1782_v58 = vld [vmem:[#allocation2 + $0x22c] ss:$16 sps:$4 sm:$0xff]   ;;  %v1780_v61 = vld [vmem:[#allocation2 + $0x228] ss:$16 sps:$4 sm:$0xff]  }
  0x5f   :  { %952 = vmatprep.subr.bf16.mxu0 %v1759_v60  ;;  %v1777_v60 = vld [vmem:[#allocation2 + $0x220] ss:$16 sps:$4 sm:$0xff]  }
  0x61   :  { %1035 = vmatpush1.bf16.msra.mxu1 %v1764_v63  ;;  %v1788_v63 = vld [vmem:[#allocation2 + $0x24c] ss:$16 sps:$4 sm:$0xff]  }
  0x62   :  { %953 = vmatpush1.bf16.msra.mxu0 %v1763_v62  ;;  %1036 = vmatprep.subr.bf16.mxu1 %v1767_v1  ;;  %v1785_v62 = vld [vmem:[#allocation2 + $0x244] ss:$16 sps:$4 sm:$0xff]   ;;  %v1786_v1 = vld [vmem:[#allocation2 + $0x248] ss:$16 sps:$4 sm:$0xff]  }
  0x63   :  { %954 = vmatprep.subr.bf16.mxu0 %v1765_v0  ;;  %v1783_v0 = vld [vmem:[#allocation2 + $0x240] ss:$16 sps:$4 sm:$0xff]  }
  0x65   :  { %1037 = vmatpush1.bf16.msra.mxu1 %v1770_v3  ;;  %v1794_v3 = vld [vmem:[#allocation2 + $0x26c] ss:$16 sps:$4 sm:$0xff]  }
  0x66   :  { %955 = vmatpush1.bf16.msra.mxu0 %v1769_v2  ;;  %1047 = vmatprep.subr.bf16.mxu1 %v1776_v5  ;;  %v1791_v2 = vld [vmem:[#allocation2 + $0x264] ss:$16 sps:$4 sm:$0xff]   ;;  %v1792_v5 = vld [vmem:[#allocation2 + $0x268] ss:$16 sps:$4 sm:$0xff]  }
  0x67   :  { %965 = vmatprep.subr.bf16.mxu0 %v1773_v4  ;;  %v1789_v4 = vld [vmem:[#allocation2 + $0x260] ss:$16 sps:$4 sm:$0xff]  }
  0xa9   :  { %v53_v32 = vpop.permute.xlu0 %52 }
  0xaa   :  { %v110_v35 = vmul.bf16 %v100_v26, %v53_v32  ;;  %v108_v41 = vmul.bf16 %v86_v33, %v53_v32  ;;  %v109_v42 = vmul.bf16 %v93_v34, %v53_v32  ;;  %v111_v48 = vmul.bf16 %v107_v40, %v53_v32  ;;  %v1827_v26 = vld [vmem:[#allocation2 + $0x324] ss:$16 sps:$4 sm:$0xff]   ;;  %v1831_v32 = vld [vmem:[#allocation2 + $0x340] ss:$16 sps:$4 sm:$0xff]   ;;  %v1834_v33 = vld [vmem:[#allocation2 + $0x348] ss:$16 sps:$4 sm:$0xff]  }
  0xab   :  { %v1839_v34 = vld [vmem:[#allocation2 + $0x364] ss:$16 sps:$4 sm:$0xff]   ;;  %v1843_v40 = vld [vmem:[#allocation2 + $0x380] ss:$16 sps:$4 sm:$0xff]  }
  0xae   :  { %v114_v43 = vpop.permute.xlu0 %113 }
  0xaf   :  { %v144_v44 = vmul.bf16 %v122_v36, %v114_v43  ;;  %v145_v45 = vmul.bf16 %v129_v37, %v114_v43  ;;  %v146_v46 = vmul.bf16 %v136_v38, %v114_v43  ;;  %v147_v47 = vmul.bf16 %v143_v39, %v114_v43  ;;  %v1837_v36 = vld [vmem:[#allocation2 + $0x360] ss:$16 sps:$4 sm:$0xff]   ;;  %v1840_v37 = vld [vmem:[#allocation2 + $0x368] ss:$16 sps:$4 sm:$0xff]   ;;  %v1845_v38 = vld [vmem:[#allocation2 + $0x384] ss:$16 sps:$4 sm:$0xff]  }
  0xb0   :  { %v1848_v39 = vld [vmem:[#allocation2 + $0x38c] ss:$16 sps:$4 sm:$0xff]  }
  0xb1   :  { %v148_v49 = vadd.bf16 %v144_v44, %v108_v41  ;;  %v149_v50 = vadd.bf16 %v145_v45, %v109_v42  ;;  %v2052_v51 = vadd.bf16 %v146_v46, %v110_v35  ;;  %v151_v52 = vadd.bf16 %v147_v47, %v111_v48  ;;  %v1842_v35 = vld [vmem:[#allocation2 + $0x36c] ss:$16 sps:$4 sm:$0xff]   ;;  %v1846_v41 = vld [vmem:[#allocation2 + $0x388] ss:$16 sps:$4 sm:$0xff]   ;;  %v1851_v42 = vld [vmem:[#allocation2 + $0x3a4] ss:$16 sps:$4 sm:$0xff]  }
  0xb2   :  { %v1854_v43 = vld [vmem:[#allocation2 + $0x3ac] ss:$16 sps:$4 sm:$0xff]   ;;  %v1849_v44 = vld [vmem:[#allocation2 + $0x3a0] ss:$16 sps:$4 sm:$0xff]   ;;  %v1852_v45 = vld [vmem:[#allocation2 + $0x3a8] ss:$16 sps:$4 sm:$0xff]  }
  0xb3   :  { %1899 = vtanh.bf16 %v148_v49  ;;  %v1857_v46 = vld [vmem:[#allocation2 + $0x3c4] ss:$16 sps:$4 sm:$0xff]   ;;  %v1860_v47 = vld [vmem:[#allocation2 + $0x3cc] ss:$16 sps:$4 sm:$0xff]   ;;  %v1855_v48 = vld [vmem:[#allocation2 + $0x3c0] ss:$16 sps:$4 sm:$0xff]  }
  0xb4   :  { %1901 = vtanh.bf16 %v149_v50  ;;  %v1858_v49 = vld [vmem:[#allocation2 + $0x3c8] ss:$16 sps:$4 sm:$0xff]   ;;  %v1863_v50 = vld [vmem:[#allocation2 + $0x3e4] ss:$16 sps:$4 sm:$0xff]  }
  0xb5   :  { %1903 = vtanh.bf16 %v151_v52  ;;  %v1866_v52 = vld [vmem:[#allocation2 + $0x3ec] ss:$16 sps:$4 sm:$0xff]  }
  0xb6   :  { %1905 = vtanh.bf16 %v2052_v51  ;;  %v1870_v51 = vld [vmem:[#allocation5 + $0x80] sm:$0xff]  }
  0xbe   :  { %v1900_v53 = vpop.eup %1899 }
  0xbf   :  { %v1902_v56 = vpop.eup %1901 }
  0xc0   :  { %956 = vmatprep.mubr.bf16.mxu0 %v1902_v56  ;;  %1038 = vmatprep.mubr.bf16.mxu1 %v1902_v56  ;;  %v1904_v59 = vpop.eup %1903  ;;  %v1868_v56 = vld [vmem:[#allocation5 + $0xc0] sm:$0xff]  }
  0xc1   :  { %957 = vmatmul.mubr.bf16.vlgmr.msra.gmra.mrb[0].mxu0 %v1900_v53  ;;  %1039 = vmatmul.mubr.bf16.vlgmr.msra.gmra.mrb[0].mxu1 %v1900_v53  ;;  %v1861_v53 = vld [vmem:[#allocation2 + $0x3e0] ss:$16 sps:$4 sm:$0xff]  }
  0xc2   :  { %966 = vmatpush1.bf16.msra.mxu0 %v1771_v54  ;;  %1048 = vmatpush1.bf16.msra.mxu1 %v1774_v55  ;;  %v1864_v54 = vld [vmem:[#allocation2 + $0x3e8] ss:$16 sps:$4 sm:$0xff]   ;;  %v1867_v55 = vld [vmem:[#allocation5 + $0x40] sm:$0xff]  }
  0xc3   :  { %997 = vmatprep.mubr.bf16.mxu0 %v1904_v59  ;;  %1079 = vmatprep.mubr.bf16.mxu1 %v1904_v59  ;;  %v1872_v59 = vld [vmem:[#allocation5 + $0xc8] sm:$0xff]  }
  0xc4   :  { %967 = vmatprep.subr.bf16.mxu0 %v1779_v57  ;;  %1049 = vmatprep.subr.bf16.mxu1 %v1782_v58  ;;  %v1869_v57 = vld [vmem:[#allocation5] sm:$0xff]   ;;  %v1871_v58 = vld [vmem:[#allocation5 + $0x48] sm:$0xff]  }
  0xc6   :  { %968 = vmatpush1.bf16.msra.mxu0 %v1777_v60  ;;  %1050 = vmatpush1.bf16.msra.mxu1 %v1780_v61  ;;  %v1906_v60 = vpop.eup %1905  ;;  %v1873_v61 = vld [vmem:[#allocation5 + $0x8] sm:$0xff]  }
  0xc7   :  { %969 = vmatprep.subr.bf16.mxu0 %v1785_v62  ;;  %1051 = vmatprep.subr.bf16.mxu1 %v1788_v63  ;;  %v1874_v62 = vld [vmem:[#allocation5 + $0x88] sm:$0xff]   ;;  %v1875_v63 = vld [vmem:[#allocation5 + $0x50] sm:$0xff]  }
  0xca   :  { %970 = vmatpush1.bf16.msra.mxu0 %v1783_v0  ;;  %1052 = vmatpush1.bf16.msra.mxu1 %v1786_v1  ;;  %v1876_v0 = vld [vmem:[#allocation5 + $0xd0] sm:$0xff]  }
  0xcb   :  { %971 = vmatprep.subr.bf16.mxu0 %v1791_v2  ;;  %1053 = vmatprep.subr.bf16.mxu1 %v1794_v3  ;;  %v1877_v1 = vld [vmem:[#allocation5 + $0x10] sm:$0xff]   ;;  %v1879_v3 = vld [vmem:[#allocation5 + $0x58] sm:$0xff]  }
  0xcc   :  { %v1878_v2 = vld [vmem:[#allocation5 + $0x90] sm:$0xff]  }
  0xce   :  { %972 = vmatpush1.bf16.msra.mxu0 %v1789_v4  ;;  %1054 = vmatpush1.bf16.msra.mxu1 %v1792_v5  ;;  %v1880_v4 = vld [vmem:[#allocation5 + $0xd8] sm:$0xff]  }
  0xcf   :  { %973 = vmatprep.subr.bf16.mxu0 %v1797_v6  ;;  %1055 = vmatprep.subr.bf16.mxu1 %v1800_v7  ;;  %v1881_v5 = vld [vmem:[#allocation5 + $0x18] sm:$0xff]   ;;  %v1883_v7 = vld [vmem:[#allocation5 + $0x60] sm:$0xff]  }
  0xd0   :  { %v1882_v6 = vld [vmem:[#allocation5 + $0x98] sm:$0xff]  }
  0xd2   :  { %974 = vmatpush1.bf16.msra.mxu0 %v1795_v8  ;;  %1056 = vmatpush1.bf16.msra.mxu1 %v1798_v9  ;;  %v1884_v8 = vld [vmem:[#allocation5 + $0xe0] sm:$0xff]  }
  0xd3   :  { %975 = vmatprep.subr.bf16.mxu0 %v1803_v10  ;;  %1057 = vmatprep.subr.bf16.mxu1 %v1806_v11  ;;  %v1885_v9 = vld [vmem:[#allocation5 + $0x20] sm:$0xff]   ;;  %v1887_v11 = vld [vmem:[#allocation5 + $0x68] sm:$0xff]  }
  0xd4   :  { %v1886_v10 = vld [vmem:[#allocation5 + $0xa0] sm:$0xff]  }
  0xd6   :  { %976 = vmatpush1.bf16.msra.mxu0 %v1801_v12  ;;  %1058 = vmatpush1.bf16.msra.mxu1 %v1804_v13  ;;  %v1888_v12 = vld [vmem:[#allocation5 + $0xe8] sm:$0xff]  }
  0xd7   :  { %977 = vmatprep.subr.bf16.mxu0 %v1809_v14  ;;  %1059 = vmatprep.subr.bf16.mxu1 %v1812_v15  ;;  %v1889_v13 = vld [vmem:[#allocation5 + $0x28] sm:$0xff]   ;;  %v1891_v15 = vld [vmem:[#allocation5 + $0x70] sm:$0xff]  }
  0xd8   :  { %v1890_v14 = vld [vmem:[#allocation5 + $0xa8] sm:$0xff]  }
  0xda   :  { %978 = vmatpush1.bf16.msra.mxu0 %v1807_v16  ;;  %1060 = vmatpush1.bf16.msra.mxu1 %v1810_v17  ;;  %v1892_v16 = vld [vmem:[#allocation5 + $0xf0] sm:$0xff]  }
  0xdb   :  { %979 = vmatprep.subr.bf16.mxu0 %v1815_v18  ;;  %1061 = vmatprep.subr.bf16.mxu1 %v1818_v19  ;;  %v1893_v17 = vld [vmem:[#allocation5 + $0x30] sm:$0xff]   ;;  %v1895_v19 = vld [vmem:[#allocation5 + $0x78] sm:$0xff]  }
  0xdc   :  { %v1894_v18 = vld [vmem:[#allocation5 + $0xb0] sm:$0xff]  }
  0xde   :  { %980 = vmatpush1.bf16.msra.mxu0 %v1813_v20  ;;  %1062 = vmatpush1.bf16.msra.mxu1 %v1816_v21  ;;  %v1896_v20 = vld [vmem:[#allocation5 + $0xf8] sm:$0xff]  }
  0xdf   :  { %981 = vmatprep.subr.bf16.mxu0 %v1821_v22  ;;  %1063 = vmatprep.subr.bf16.mxu1 %v1824_v23  ;;  %v1897_v21 = vld [vmem:[#allocation5 + $0x38] sm:$0xff]  }
  0xe0   :  { %v1898_v22 = vld [vmem:[#allocation5 + $0xb8] sm:$0xff]  }
  0xe2   :  { %982 = vmatpush1.bf16.msra.mxu0 %v1819_v24  ;;  %1064 = vmatpush1.bf16.msra.mxu1 %v1822_v25 }
  0xe3   :  { %983 = vmatprep.subr.bf16.mxu0 %v1827_v26  ;;  %1065 = vmatprep.subr.bf16.mxu1 %v1830_v27 }
  0xe6   :  { %984 = vmatpush1.bf16.msra.mxu0 %v1825_v28  ;;  %1066 = vmatpush1.bf16.msra.mxu1 %v1828_v29 }
  0xe7   :  { %985 = vmatprep.subr.bf16.mxu0 %v1833_v30  ;;  %1067 = vmatprep.subr.bf16.mxu1 %v1836_v31 }
  0xea   :  { %986 = vmatpush1.bf16.msra.mxu0 %v1831_v32  ;;  %1068 = vmatpush1.bf16.msra.mxu1 %v1834_v33 }
  0xeb   :  { %987 = vmatprep.subr.bf16.mxu0 %v1839_v34  ;;  %1069 = vmatprep.subr.bf16.mxu1 %v1842_v35 }
  0xee   :  { %988 = vmatpush1.bf16.msra.mxu0 %v1837_v36  ;;  %1070 = vmatpush1.bf16.msra.mxu1 %v1840_v37 }
  0xef   :  { %989 = vmatprep.subr.bf16.mxu0 %v1845_v38  ;;  %1071 = vmatprep.subr.bf16.mxu1 %v1848_v39 }
  0xf2   :  { %990 = vmatpush1.bf16.msra.mxu0 %v1843_v40  ;;  %1072 = vmatpush1.bf16.msra.mxu1 %v1846_v41 }
  0xf3   :  { %991 = vmatprep.subr.bf16.mxu0 %v1851_v42  ;;  %1073 = vmatprep.subr.bf16.mxu1 %v1854_v43 }
  0xf6   :  { %992 = vmatpush1.bf16.msra.mxu0 %v1849_v44  ;;  %1074 = vmatpush1.bf16.msra.mxu1 %v1852_v45 }
  0xf7   :  { %993 = vmatprep.subr.bf16.mxu0 %v1857_v46  ;;  %1075 = vmatprep.subr.bf16.mxu1 %v1860_v47 }
  0xfa   :  { %994 = vmatpush1.bf16.msra.mxu0 %v1855_v48  ;;  %1076 = vmatpush1.bf16.msra.mxu1 %v1858_v49 }
  0xfb   :  { %995 = vmatprep.subr.bf16.mxu0 %v1863_v50  ;;  %1077 = vmatprep.subr.bf16.mxu1 %v1866_v52 }
  0xfe   :  { %996 = vmatpush1.bf16.msra.mxu0 %v1861_v53  ;;  %1078 = vmatpush1.bf16.msra.mxu1 %v1864_v54 }
  0xff   :  { %1611 = vmatprep.subr.bf16.mxu0 %v1867_v55  ;;  %1633 = vmatprep.subr.bf16.mxu1 %v1868_v56 }
 0x101   :  { %998 = vmatmul.mubr.bf16.vlgmr.msra.gmra.mrb[0].mxu0 %v1906_v60  ;;  %1080 = vmatmul.mubr.bf16.vlgmr.msra.gmra.mrb[0].mxu1 %v1906_v60 }
 0x102   :  { %1612 = vmatpush3.bf16.msra.mxu0 %v1869_v57  ;;  %1634 = vmatpush3.bf16.msra.mxu1 %v1870_v51 }
 0x103   :  { %1613 = vmatprep.subr.bf16.mxu0 %v1871_v58  ;;  %1635 = vmatprep.subr.bf16.mxu1 %v1872_v59 }
 0x106   :  { %1614 = vmatpush3.bf16.msra.mxu0 %v1873_v61  ;;  %1636 = vmatpush3.bf16.msra.mxu1 %v1874_v62 }
 0x107   :  { %1615 = vmatprep.subr.bf16.mxu0 %v1875_v63  ;;  %1637 = vmatprep.subr.bf16.mxu1 %v1876_v0 }
 0x10a   :  { %1616 = vmatpush3.bf16.msra.mxu0 %v1877_v1  ;;  %1638 = vmatpush3.bf16.msra.mxu1 %v1878_v2 }
 0x10b   :  { %1617 = vmatprep.subr.bf16.mxu0 %v1879_v3  ;;  %1639 = vmatprep.subr.bf16.mxu1 %v1880_v4 }
 0x10e   :  { %1618 = vmatpush3.bf16.msra.mxu0 %v1881_v5  ;;  %1640 = vmatpush3.bf16.msra.mxu1 %v1882_v6 }
 0x10f   :  { %1619 = vmatprep.subr.bf16.mxu0 %v1883_v7  ;;  %1641 = vmatprep.subr.bf16.mxu1 %v1884_v8 }
 0x112   :  { %1620 = vmatpush3.bf16.msra.mxu0 %v1885_v9  ;;  %1642 = vmatpush3.bf16.msra.mxu1 %v1886_v10 }
 0x113   :  { %1621 = vmatprep.subr.bf16.mxu0 %v1887_v11  ;;  %1643 = vmatprep.subr.bf16.mxu1 %v1888_v12 }
 0x116   :  { %1622 = vmatpush3.bf16.msra.mxu0 %v1889_v13  ;;  %1644 = vmatpush3.bf16.msra.mxu1 %v1890_v14 }
 0x117   :  { %1623 = vmatprep.subr.bf16.mxu0 %v1891_v15  ;;  %1645 = vmatprep.subr.bf16.mxu1 %v1892_v16 }
 0x11a   :  { %1624 = vmatpush3.bf16.msra.mxu0 %v1893_v17  ;;  %1646 = vmatpush3.bf16.msra.mxu1 %v1894_v18 }
 0x11b   :  { %1625 = vmatprep.subr.bf16.mxu0 %v1895_v19  ;;  %1647 = vmatprep.subr.bf16.mxu1 %v1896_v20 }
 0x11e   :  { %1626 = vmatpush3.bf16.msra.mxu0 %v1897_v21  ;;  %1648 = vmatpush3.bf16.msra.mxu1 %v1898_v22 }
 0x1d4   :  { %v999_v23 = vpop.f32.mrb[0].mxu0  ;;  %v1081_v24 = vpop.f32.mrb[0].mxu1 }
 0x1d5   :  { %v1088_v25 = vpack.c.bf16 %v999_v23, %v999_v23  ;;  %v1001_v26 = vpop.f32.mrb[1].mxu0  ;;  %v1083_v27 = vpop.f32.mrb[1].mxu1  ;;  %v1090_v32 = vpack.c.bf16 %v1081_v24, %v1081_v24 }
 0x1d6   :  { %v1089_v28 = vpack.c.bf16 %v1001_v26, %v1001_v26  ;;  %v1091_v29 = vpack.c.bf16 %v1083_v27, %v1083_v27  ;;  %v1003_v30 = vpop.f32.mrb[2].mxu0  ;;  %v1085_v31 = vpop.f32.mrb[2].mxu1 }
 0x1d7   :  { %v1004_v33 = vpop.f32.mrb[3].mxu0  ;;  %v1086_v34 = vpop.f32.mrb[3].mxu1  ;;  %1907 = vtanh.bf16 %v1088_v25 }
 0x1d8   :  { %1909 = vtanh.bf16 %v1089_v28 }
 0x1d9   :  { %1911 = vtanh.bf16 %v1091_v29 }
 0x1da   :  { %1913 = vtanh.bf16 %v1090_v32 }
 0x1e2   :  { %v1908_v35 = vpop.eup %1907 }
 0x1e3   :  { %v1910_v36 = vpop.eup %1909 }
 0x1e4   :  { %v1912_v37 = vpop.eup %1911  ;;  %1384 = vmatprep.mubr.bf16.mxu0 %v1910_v36 }
 0x1e5   :  { %v1914_v38 = vpop.eup %1913  ;;  %1424 = vmatprep.mubr.bf16.mxu1 %v1912_v37  ;;  %1385 = vmatmul.mubr.bf16.vlgmr.msra.gmra.mrb[4].mxu0 %v1908_v35 }
 0x1e6   :  { %1425 = vmatmul.mubr.bf16.vlgmr.msra.gmra.mrb[4].mxu1 %v1914_v38 }
 0x2b8   :  { %v1627_v39 = vpop.f32.mrb[4].mxu0 }
 0x2b9   :  { %v1649_v40 = vpop.f32.mrb[4].mxu1  ;;  %v1628_v41 = vpop.f32.mrb[5].mxu0 }
 0x2ba   :  { %v1629_v42 = vadd.f32 %v1628_v41, %v1627_v39  ;;  %v1650_v43 = vpop.f32.mrb[5].mxu1  ;;  %v1630_v44 = vpop.f32.mrb[6].mxu0 }
 0x2bb   :  { %v1651_v45 = vadd.f32 %v1650_v43, %v1649_v40  ;;  %v1652_v46 = vpop.f32.mrb[6].mxu1  ;;  %v1631_v47 = vpop.f32.mrb[7].mxu0 }
 0x2bc   :  { %v1653_v48 = vpop.f32.mrb[7].mxu1 }
 0x2bd   :  { %v1427_v49 = vadd.f32 %v1651_v45, %v1629_v42 }
 0x2bf   :  { %v1432_v50 = vpack.c.bf16 %v1427_v49, %v1427_v49 }
 0x2c1   :  { %1433 = vst [vmem:[#allocation7] sm:$0xf] %v1432_v50 }
 0x2c2   :  { %1970 = shalt.err (!%p1967_p6)
}
 0x2c3   :  { %s1971_s22 = scalar_lea.hbm %s2071_s4, 64 }
 0x2c4   :  { %p1972_p7 = scmp.ne.s32.totalorder %s2071_s4, %s1971_s22  ;;  %p1975_p8 = scmp.lt.u32.totalorder %s1971_s22, %s2071_s4 }
 0x2c6   :  { %p1977_p9 = pnand %p1975_p8, %p1972_p7 }
 0x2c8   :  { %1980 = shalt.err (!%p1977_p9)
}
 0x2c9   :  { %1443 = dma.vmem_to_hbm [thread:$0]  %s1441_s18, 64, %s2071_s4, [#allocation4]  }
 0x2ca   :  { %1985 = dma.done.wait [#allocation4], 64  }
 0x2cb   :  { %1986 = vsyncadd [#allocation4], 4294967232 }
 0x2cc   :  { %1447 = vsyncpa [#allocation3], 1 }
 0x2cd   :  { %1448 = vsyncpa [#allocation6], 1 }
 0x2ce   :  { %1449 = vsyncpa [#allocation4], 1 }

</bundles_post_ra>
